<compile_context>
chip_gen: v5e
topology: v5e:2x2
jax: 0.10.0
libtpu: 0.0.40
codegen_flags: <defaults>
</compile_context>

<pallas_src>
import jax
import jax.numpy as jnp
from jax.experimental import pallas as pl
from jax.experimental.pallas import tpu as pltpu


def _round_up(x, m):
    return ((x + m - 1) // m) * m


def _sublane_multiple(dtype):
    # 8 for f32, 16 for bf16, 32 for int8/fp8.
    return max(8, 32 // jnp.dtype(dtype).itemsize)


def _pick_row_tile(m_rows, bytes_per_row, sublane, tile_budget_bytes):
    """Largest sublane-multiple row tile whose double-buffered in+out tiles fit
    the VMEM budget, capped at 4096 rows and at the problem size.

    Small problems get a single grid step (per-step overhead ~0.35 us would
    dominate).  Large problems prefer an even step count >= 4 so v7x's two
    TensorCores are load-balanced under dimension_semantics=("parallel",),
    but only while tiles stay >= 512 rows.
    """
    cap = max(sublane,
              (tile_budget_bytes // (2 * bytes_per_row)) // sublane * sublane)
    tm = min(cap, 4096, _round_up(m_rows, sublane))
    tm = max(sublane, (tm // sublane) * sublane)
    n = pl.cdiv(m_rows, tm)
    if n >= 2:
        n_even = max(4, n + (n % 2))
        tm_even = _round_up(pl.cdiv(m_rows, n_even), sublane)
        if tm_even >= 512:
            tm = tm_even
    return tm


def _fused_value_concat_kernel(in_ref, w_ref, b_ref, out_ref):
    """out = packed_rows @ blockdiag_k([I_Cl | Wv^T]) + tiled([0 | bv]).

    One MXU matmul per row tile; the identity blocks pass local_features
    through already interleaved with the value transform, so the stored block
    IS cat([local, V], -1) for k rows per lane-packed row.
    """
    acc = jnp.dot(in_ref[...], w_ref[...],
                  preferred_element_type=jnp.float32,
                  precision=jax.lax.Precision.HIGHEST)
    out_ref[...] = (acc + b_ref[...]).astype(out_ref.dtype)


def attention_fusion(global_features, local_features, params, output_channels):
    """Forward pass of AttentionFusion (same output as the PyTorch module)."""
    del global_features  # mathematically dead for the forward output (see header)
    B, S, P, Cl = local_features.shape
    Cout = output_channels
    Cf = Cl + Cout
    dtype = local_features.dtype
    wv, bv = params["wv"], params["bv"]          # wv: [Cout, Cl], bv: [1, Cout]

    # Per-row augmented weight/bias: concat fused into the matmul.
    w_aug = jnp.concatenate(
        [jnp.eye(Cl, dtype=jnp.float32), jnp.transpose(wv).astype(jnp.float32)],
        axis=1)                                                    # (Cl, Cf)
    b_aug = jnp.concatenate(
        [jnp.zeros((1, Cl), jnp.float32), bv.astype(jnp.float32)], axis=1)  # (1, Cf)

    M = B * S * P

    # Lane packing factor: fold k consecutive rows into 128 lanes when possible.
    if Cl <= 128 and 128 % Cl == 0 and M % (128 // Cl) == 0:
        k = 128 // Cl
    else:
        k = 1  # fallback: still a single fused (local|value) matmul, narrower blocks

    Mp = M // k
    in_w = k * Cl
    out_w = k * Cf

    if k == 1:
        w_packed = w_aug
        b_packed = b_aug
    else:
        idx = jnp.arange(k)
        w_packed = jnp.zeros((k, Cl, k, Cf), jnp.float32)
        w_packed = w_packed.at[idx, :, idx, :].set(w_aug)          # block-diagonal
        w_packed = w_packed.reshape(in_w, out_w)
        b_packed = jnp.tile(b_aug, (1, k))
    w_packed = w_packed.astype(dtype)

    # Free reshape: rows are contiguous in HBM, so (B,S,P,Cl) -> (Mp, k*Cl).
    in2d = local_features.reshape(Mp, in_w)

    # Chip-aware VMEM budget (v7x: 64 MiB physical vs 128 MiB on v5e/v6e).
    try:
        vmem_cap = int(pltpu.get_tpu_info().vmem_capacity_bytes)
    except Exception:
        vmem_cap = 64 << 20
    tile_budget = min(vmem_cap // 3, 24 << 20)

    elt = jnp.dtype(dtype).itemsize
    sublane = _sublane_multiple(dtype)
    bytes_per_row = (in_w + out_w) * elt
    tm = _pick_row_tile(Mp, bytes_per_row, sublane, tile_budget)
    n_tiles = pl.cdiv(Mp, tm)  # ragged last block handled by Pallas masking (no jnp.pad)

    weight_bytes = in_w * out_w * elt + out_w * 4
    vmem_limit = int(min(
        max(2 * tm * bytes_per_row + 2 * weight_bytes + (2 << 20), 4 << 20),
        min(vmem_cap // 2, 48 << 20)))

    out2d = pl.pallas_call(
        _fused_value_concat_kernel,
        out_shape=jax.ShapeDtypeStruct((Mp, out_w), dtype),
        grid_spec=pltpu.PrefetchScalarGridSpec(
            num_scalar_prefetch=0,
            grid=(n_tiles,),
            in_specs=[
                pl.BlockSpec((tm, in_w), lambda i: (i, 0)),
                pl.BlockSpec((in_w, out_w), lambda i: (0, 0)),  # resident across grid
                pl.BlockSpec((1, out_w), lambda i: (0, 0)),     # resident across grid
            ],
            out_specs=pl.BlockSpec((tm, out_w), lambda i: (i, 0)),
        ),
        compiler_params=pltpu.CompilerParams(
            dimension_semantics=("parallel",),
            vmem_limit_bytes=vmem_limit,
        ),
    )(in2d, w_packed, b_packed)

    # Free reshape back: each packed row holds k already-concatenated Cf-rows.
    return out2d.reshape(B, S, P, Cf)


def attention_fusion_ref(g, loc, params, Cout):
    """Pure-JAX reference mirroring the full PyTorch forward (no shortcuts)."""
    hp = jax.lax.Precision.HIGHEST
    wq, bq = params["wq"], params["bq"][0]
    wk, bk = params["wk"], params["bk"][0]
    wv, bv = params["wv"], params["bv"][0]
    gn = g / jnp.maximum(jnp.sqrt(jnp.sum(g * g, axis=1, keepdims=True)), 1e-12)
    Q = jnp.einsum('bcn,oc->bno', gn, wq, precision=hp) + bq
    K = jnp.einsum('bspc,oc->bspo', loc, wk, precision=hp) + bk
    V = jnp.einsum('bspc,oc->bspo', loc, wv, precision=hp) + bv
    scores = jnp.einsum('bqc,blkc->blq', Q, K, precision=hp) / (Cout ** 0.5)
    w = jax.nn.softmax(scores, axis=-1)
    fused = jnp.einsum('blq,blkc->blkc', w, V, precision=hp)
    return jnp.concatenate([loc, fused], axis=-1)


if __name__ == "__main__":
    # Small shapes consistent with the module's conventions.
    B, Cin, N = 2, 32, 16          # global_features: [B, input_channels, N]
    S, P, Cl = 4, 8, 16            # local_features:  [B, S, P, local_channels]
    Cout = 32                      # output_channels

    key = jax.random.PRNGKey(0)
    k_g, k_l, k_wq, k_bq, k_wk, k_bk, k_wv, k_bv, k_l2 = jax.random.split(key, 9)

    global_features = jax.random.normal(k_g, (B, Cin, N), jnp.float32)
    local_features = jax.random.normal(k_l, (B, S, P, Cl), jnp.float32)

    # PyTorch-Linear-shaped parameters: weight [out, in], bias stored as (1, out).
    params = {
        "wq": 0.05 * jax.random.normal(k_wq, (Cout, Cin), jnp.float32),
        "bq": 0.05 * jax.random.normal(k_bq, (1, Cout), jnp.float32),
        "wk": 0.05 * jax.random.normal(k_wk, (Cout, Cl), jnp.float32),
        "bk": 0.05 * jax.random.normal(k_bk, (1, Cout), jnp.float32),
        "wv": 0.05 * jax.random.normal(k_wv, (Cout, Cl), jnp.float32),
        "bv": 0.05 * jax.random.normal(k_bv, (1, Cout), jnp.float32),
    }

    out = attention_fusion(global_features, local_features, params, Cout)
    out = jax.block_until_ready(out)
    ref = attention_fusion_ref(global_features, local_features, params, Cout)
    assert out.shape == (B, S, P, Cl + Cout), out.shape
    assert jnp.allclose(out, ref, rtol=1e-4, atol=1e-4), \
        float(jnp.max(jnp.abs(out - ref)))

    # Ragged check: packed row count (Mp=10) not a multiple of the row tile, so
    # the last (only) block is partial and exercises Pallas's masked tail writes.
    S2 = 5
    local2 = jax.random.normal(k_l2, (B, S2, P, Cl), jnp.float32)
    out2 = attention_fusion(global_features, local2, params, Cout)
    out2 = jax.block_until_ready(out2)
    ref2 = attention_fusion_ref(global_features, local2, params, Cout)
    assert out2.shape == (B, S2, P, Cl + Cout), out2.shape
    assert jnp.allclose(out2, ref2, rtol=1e-4, atol=1e-4), \
        float(jnp.max(jnp.abs(out2 - ref2)))

    print("KERNEL_OK")
</pallas_src>

<mosaic_0001>
module attributes {stable_mosaic.version = 11 : i64} {
  func.func @_fused_value_concat_kernel(%arg0: i32, %arg1: memref<8x128xf32, #tpu.memory_space<vmem>>, %arg2: memref<128x384xf32, #tpu.memory_space<vmem>>, %arg3: memref<1x384xf32, #tpu.memory_space<vmem>>, %arg4: memref<8x384xf32, #tpu.memory_space<vmem>>) attributes {dimension_semantics = [#tpu.dimension_semantics<parallel>], iteration_bounds = array<i64: 1>, scalar_prefetch = 0 : i64, scratch_operands = 0 : i64, tpu.core_type = #tpu.core_type<tc>, window_params = [{transform_indices = @transform_0, window_bounds = array<i64: 8, 128>}, {pipeline_mode = #tpu.pipeline_mode<synchronous>, transform_indices = @transform_1, window_bounds = array<i64: 128, 384>}, {pipeline_mode = #tpu.pipeline_mode<synchronous>, transform_indices = @transform_2, window_bounds = array<i64: 1, 384>}, {transform_indices = @transform_3, window_bounds = array<i64: 8, 384>}]} {
    %c0 = arith.constant 0 : index
    %c0_0 = arith.constant 0 : index
    %0 = vector.load %arg1[%c0, %c0_0] : memref<8x128xf32, #tpu.memory_space<vmem>>, vector<8x128xf32>
    %c0_1 = arith.constant 0 : index
    %c0_2 = arith.constant 0 : index
    %1 = vector.load %arg2[%c0_1, %c0_2] : memref<128x384xf32, #tpu.memory_space<vmem>>, vector<128x384xf32>
    %cst = arith.constant dense<0.000000e+00> : vector<8x384xf32>
    %2 = tpu.matmul %0, %1, %cst {dimension_numbers = #tpu.dot_dimension_numbers<[1], [0], [0], [1], [0, 0, 1, 1], [], []>, precision = #tpu.contract_precision<fp32>} : vector<8x128xf32>, vector<128x384xf32>, vector<8x384xf32> -> vector<8x384xf32>
    %c0_3 = arith.constant 0 : index
    %c0_4 = arith.constant 0 : index
    %3 = vector.load %arg3[%c0_3, %c0_4] : memref<1x384xf32, #tpu.memory_space<vmem>>, vector<1x384xf32>
    %4 = vector.broadcast %3 : vector<1x384xf32> to vector<8x384xf32>
    %5 = arith.addf %2, %4 : vector<8x384xf32>
    %c0_5 = arith.constant 0 : index
    %c0_6 = arith.constant 0 : index
    %6 = vector.load %arg4[%c0_5, %c0_6] : memref<8x384xf32, #tpu.memory_space<vmem>>, vector<8x384xf32>
    tpu.vector_store %arg4[%c0_5, %c0_6], %5 {strides = array<i32>} : memref<8x384xf32, #tpu.memory_space<vmem>>, vector<8x384xf32>,
    return
  }
  func.func @transform_0(%arg0: i32) -> (i32, i32) {
    %c0_i32 = arith.constant 0 : i32
    %c0_i32_0 = arith.constant 0 : i32
    return %arg0, %c0_i32 : i32, i32
  }
  func.func @transform_1(%arg0: i32) -> (i32, i32) {
    %c0_i32 = arith.constant 0 : i32
    %c0_i32_0 = arith.constant 0 : i32
    %c0_i32_1 = arith.constant 0 : i32
    return %c0_i32, %c0_i32_0 : i32, i32
  }
  func.func @transform_2(%arg0: i32) -> (i32, i32) {
    %c0_i32 = arith.constant 0 : i32
    %c0_i32_0 = arith.constant 0 : i32
    %c0_i32_1 = arith.constant 0 : i32
    return %c0_i32, %c0_i32_0 : i32, i32
  }
  func.func @transform_3(%arg0: i32) -> (i32, i32) {
    %c0_i32 = arith.constant 0 : i32
    %c0_i32_0 = arith.constant 0 : i32
    return %arg0, %c0_i32 : i32, i32
  }
}

</mosaic_0001>

<bundles_post_ra>
// kernel: tpu_custom_call.1
= control target key start
LH: loop header
LB: loop body
LE: loop exit
PB: predicated region body
PF: predicated region fallthrough
CT: control target
= control target key end

     0   :  { %8 = vsyncpa [#allocation3], 0  ;;  %s2055_s0 = inlined_call_operand.hbm [shape: f32[8,128], index: 0, kind: input, shape index: {}]   ;;  %s2056_s1 = inlined_call_operand.hbm [shape: f32[128,384], index: 1, kind: input, shape index: {}]   ;;  %s2057_s2 = inlined_call_operand.hbm [shape: f32[1,384], index: 2, kind: input, shape index: {}]   ;;  %s2058_s3 = inlined_call_operand.hbm [shape: f32[8,384], index: 3, kind: output, shape index: {}]  }
   0x1   :  { %9 = vsyncpa [#allocation6], 0  ;;  %s26_s14 = sshll.u32 %s2056_s1, 4  ;;  %s27_s14 = int_to_ptr.hbm [resolvable:$true] %s26_s14 }
   0x2   :  { %10 = vsyncpa [#allocation4], 0  ;;  %s1267_s15 = smov [#allocation5]   ;;  %s16_s19 = sshll.u32 %s2055_s0, 4  ;;  %s17_s19 = int_to_ptr.hbm [resolvable:$true] %s16_s19 }
   0x3   :  { %s28_s16 = sshll.u32 %s1267_s15, 4  ;;  %s1268_s20 = smov 384   ;;  %s29_s16 = int_to_ptr.vmem [resolvable:$true] %s28_s16 }
   0x4   :  { %s1269_s21 = smov 24   ;;  %s1270_s22 = smov [#allocation2]  }
   0x5   :  { %34 = dma.hbm_to_vmem [thread:$0]  %s27_s14, 6144, %s29_s16, [#allocation6], %s1268_s20, %s1268_s20, %s1269_s21  }
   0x6   :  { %s18_s23 = sshll.u32 %s1270_s22, 4  ;;  %s40_s26 = sshll.u32 %s2057_s2, 4  ;;  %s19_s23 = int_to_ptr.vmem [resolvable:$true] %s18_s23  ;;  %s41_s26 = int_to_ptr.hbm [resolvable:$true] %s40_s26 }
   0x7   :  { %21 = dma.hbm_to_vmem [thread:$0]  %s17_s19, 128, %s19_s23, [#allocation3]  }
   0x8   :  { %s1271_s1 = smov [#allocation7]  }
   0x9   :  { %s42_s27 = sshll.u32 %s1271_s1, 4  ;;  %s43_s27 = int_to_ptr.vmem [resolvable:$true] %s42_s27 }
   0xa   :  { %45 = dma.hbm_to_vmem [thread:$0]  %s41_s26, 48, %s43_s27, [#allocation6]  }
   0xb   :  { %1261 = dma.done.wait [#allocation3], 128  }
   0xc   :  { %1262 = vsyncadd [#allocation3], 4294967168 }
   0xd   :  { %1263 = dma.done.wait [#allocation6], 6192  }
   0xe   :  { %1264 = vsyncadd [#allocation6], 4294961104  ;;  %v104_v0 = vld [vmem:[#allocation5 + $0x168] sm:$0xff]  ;;  %v101_v1 = vld [vmem:[#allocation5 + $0x150] sm:$0xff]  ;;  %s1272_s0 = smov [#allocation8]   ;;  %s1148_s30 = sshll.u32 %s2058_s3, 4  ;;  %s1149_s30 = int_to_ptr.hbm [resolvable:$true] %s1148_s30 }
   0xf   :  { %v98_v2 = vld [vmem:[#allocation5 + $0x138] sm:$0xff]  ;;  %v1302_v3 = vand.u32 4294901760, %v104_v0  ;;  %v1304_v4 = vand.u32 4294901760, %v101_v1  ;;  %v95_v6 = vld [vmem:[#allocation5 + $0x120] sm:$0xff]  ;;  %v92_v7 = vld [vmem:[#allocation5 + $0x108] sm:$0xff]  ;;  %s1146_s2 = sshll.u32 %s1272_s0, 4  ;;  %s1147_s2 = int_to_ptr.vmem [resolvable:$true] %s1146_s2 }
  0x10   :  { %v1306_v5 = vand.u32 4294901760, %v98_v2  ;;  %v89_v8 = vld [vmem:[#allocation5 + $0xf0] sm:$0xff]  ;;  %v1308_v9 = vand.u32 4294901760, %v95_v6  ;;  %v1310_v10 = vand.u32 4294901760, %v92_v7  ;;  %v86_v12 = vld [vmem:[#allocation5 + $0xd8] sm:$0xff]  ;;  %v83_v13 = vld [vmem:[#allocation5 + $0xc0] sm:$0xff] }
  0x11   :  { %v1312_v11 = vand.u32 4294901760, %v89_v8  ;;  %116 = vmatpush.msra.mxu0 %v1302_v3  ;;  %v1316_v14 = vsub.f32 %v104_v0, %v1302_v3  ;;  %v1319_v15 = vsub.f32 %v101_v1, %v1304_v4  ;;  %v1324_v17 = vand.u32 4294901760, %v86_v12  ;;  %312 = vmatpush.msra.mxu3 %v1302_v3  ;;  %v80_v21 = vld [vmem:[#allocation5 + $0xa8] sm:$0xff]  ;;  %v77_v34 = vld [vmem:[#allocation5 + $0x90] sm:$0xff]  ;;  %v74_v35 = vld [vmem:[#allocation5 + $0x78] sm:$0xff] }
  0x12   :  { %v1322_v16 = vsub.f32 %v98_v2, %v1306_v5  ;;  %v1328_v18 = vsub.f32 %v95_v6, %v1308_v9  ;;  %v1331_v19 = vsub.f32 %v92_v7, %v1310_v10  ;;  %v1340_v25 = vand.u32 4294901760, %v83_v13  ;;  %v71_v42 = vld [vmem:[#allocation5 + $0x60] sm:$0xff]  ;;  %v68_v47 = vld [vmem:[#allocation5 + $0x48] sm:$0xff]  ;;  %v65_v53 = vld [vmem:[#allocation5 + $0x30] sm:$0xff] }
  0x13   :  { %v1334_v20 = vsub.f32 %v89_v8, %v1312_v11  ;;  %118 = vmatpush.msra.mxu0 %v1304_v4  ;;  %v158_v22 = vand.u32 4294901760, %v1316_v14  ;;  %v164_v23 = vand.u32 4294901760, %v1319_v15  ;;  %259 = vmatpush.msra.mxu2 %v1316_v14  ;;  %v1346_v28 = vsub.f32 %v86_v12, %v1324_v17  ;;  %v62_v59 = vld [vmem:[#allocation5 + $0x18] sm:$0xff]  ;;  %v59_v1 = vld [vmem:[#allocation5] sm:$0xff] }
  0x14   :  { %v170_v24 = vand.u32 4294901760, %v1322_v16  ;;  %v2073_v26 = vand.u32 4294901760, %v1328_v18  ;;  %v2070_v27 = vand.u32 4294901760, %v1331_v19  ;;  %314 = vmatpush.msra.mxu3 %v1304_v4  ;;  %v1359_v32 = vand.u32 4294901760, %v80_v21 }
  0x15   :  { %v159_v29 = vsub.f32 %v1316_v14, %v158_v22  ;;  %120 = vmatpush.msra.mxu0 %v1306_v5  ;;  %v165_v30 = vsub.f32 %v1319_v15, %v164_v23  ;;  %262 = vmatpush.msra.mxu2 %v1319_v15  ;;  %v2069_v33 = vand.u32 4294901760, %v1334_v20  ;;  %v1369_v39 = vsub.f32 %v83_v13, %v1340_v25 }
  0x16   :  { %v171_v31 = vsub.f32 %v1322_v16, %v170_v24  ;;  %316 = vmatpush.msra.mxu3 %v1306_v5  ;;  %v177_v38 = vsub.f32 %v1328_v18, %v2073_v26  ;;  %v183_v40 = vsub.f32 %v1331_v19, %v2070_v27  ;;  %v2066_v41 = vand.u32 4294901760, %v1346_v28 }
  0x17   :  { %v160_v36 = vand.u32 4294901760, %v159_v29  ;;  %v166_v37 = vand.u32 4294901760, %v165_v30  ;;  %122 = vmatpush.msra.mxu0 %v1308_v9  ;;  %265 = vmatpush.msra.mxu2 %v1322_v16  ;;  %v1378_v44 = vand.u32 4294901760, %v77_v34  ;;  %v1381_v45 = vsub.f32 %v80_v21, %v1359_v32  ;;  %v105_v29 = vld [vmem:[#allocation5 + $0x170] sm:$0xff]  ;;  %v75_v16 = vld [vmem:[#allocation5 + $0x80] sm:$0xff] }
  0x18   :  { %318 = vmatpush.msra.mxu3 %v1308_v9  ;;  %v172_v43 = vand.u32 4294901760, %v171_v31  ;;  %v1383_v46 = vand.u32 4294901760, %v74_v35  ;;  %v189_v48 = vsub.f32 %v1334_v20, %v2069_v33  ;;  %v178_v49 = vand.u32 4294901760, %v177_v38  ;;  %v102_v38 = vld [vmem:[#allocation5 + $0x158] sm:$0xff] }
  0x19   :  { %161 = vmatpush.msra.mxu1 %v160_v36  ;;  %124 = vmatpush.msra.mxu0 %v1310_v10  ;;  %v2065_v50 = vand.u32 4294901760, %v1369_v39  ;;  %v1393_v51 = vsub.f32 %v77_v34, %v1378_v44  ;;  %v1395_v52 = vand.u32 4294901760, %v71_v42  ;;  %v1397_v54 = vand.u32 4294901760, %v68_v47 }
  0x1a   :  { %268 = vmatpush.msra.mxu2 %v1328_v18  ;;  %320 = vmatpush.msra.mxu3 %v1310_v10  ;;  %v184_v55 = vand.u32 4294901760, %v183_v40  ;;  %v195_v56 = vsub.f32 %v1346_v28, %v2066_v41  ;;  %v2063_v57 = vand.u32 4294901760, %v1381_v45  ;;  %v1407_v58 = vsub.f32 %v74_v35, %v1383_v46 }
  0x1b   :  { %167 = vmatpush.msra.mxu1 %v166_v37  ;;  %126 = vmatpush.msra.mxu0 %v1312_v11  ;;  %v1409_v60 = vand.u32 4294901760, %v65_v53  ;;  %v190_v61 = vand.u32 4294901760, %v189_v48  ;;  %v201_v62 = vsub.f32 %v1369_v39, %v2065_v50  ;;  %v2062_v63 = vand.u32 4294901760, %v1393_v51 }
  0x1c   :  { %271 = vmatpush.msra.mxu2 %v1331_v19  ;;  %322 = vmatpush.msra.mxu3 %v1312_v11  ;;  %v1419_v0 = vsub.f32 %v71_v42, %v1395_v52  ;;  %v1422_v2 = vsub.f32 %v68_v47, %v1397_v54  ;;  %v1424_v6 = vand.u32 4294901760, %v62_v59  ;;  %v196_v7 = vand.u32 4294901760, %v195_v56 }
  0x1d   :  { %173 = vmatpush.msra.mxu1 %v172_v43  ;;  %128 = vmatpush.msra.mxu0 %v1324_v17  ;;  %v207_v8 = vsub.f32 %v1381_v45, %v2063_v57  ;;  %v2061_v12 = vand.u32 4294901760, %v1407_v58  ;;  %v1434_v13 = vsub.f32 %v65_v53, %v1409_v60  ;;  %v1436_v21 = vand.u32 4294901760, %v59_v1  ;;  %v99_v53 = vld [vmem:[#allocation5 + $0x140] sm:$0xff]  ;;  %v90_v57 = vld [vmem:[#allocation5 + $0xf8] sm:$0xff] }
  0x1e   :  { %274 = vmatpush.msra.mxu2 %v1334_v20  ;;  %324 = vmatpush.msra.mxu3 %v1324_v17  ;;  %v202_v30 = vand.u32 4294901760, %v201_v62  ;;  %v213_v31 = vsub.f32 %v1393_v51, %v2062_v63  ;;  %v2060_v34 = vand.u32 4294901760, %v1419_v0  ;;  %v1445_v35 = vand.u32 4294901760, %v105_v29 }
  0x1f   :  { %179 = vmatpush.msra.mxu1 %v178_v49  ;;  %130 = vmatpush.msra.mxu0 %v1340_v25  ;;  %v2059_v36 = vand.u32 4294901760, %v1422_v2  ;;  %v1449_v37 = vsub.f32 %v62_v59, %v1424_v6  ;;  %v208_v40 = vand.u32 4294901760, %v207_v8  ;;  %v219_v42 = vsub.f32 %v1407_v58, %v2061_v12 }
  0x20   :  { %277 = vmatpush.msra.mxu2 %v1346_v28  ;;  %326 = vmatpush.msra.mxu3 %v1340_v25  ;;  %v1457_v43 = vand.u32 4294901760, %v102_v38  ;;  %v1460_v47 = vsub.f32 %v105_v29, %v1445_v35  ;;  %v2064_v48 = vand.u32 4294901760, %v1434_v13  ;;  %v1464_v49 = vsub.f32 %v59_v1, %v1436_v21 }
  0x21   :  { %185 = vmatpush.msra.mxu1 %v184_v55  ;;  %132 = vmatpush.msra.mxu0 %v1359_v32  ;;  %v214_v55 = vand.u32 4294901760, %v213_v31  ;;  %v225_v56 = vsub.f32 %v1419_v0, %v2060_v34  ;;  %v1472_v59 = vand.u32 4294901760, %v99_v53  ;;  %v231_v62 = vsub.f32 %v1422_v2, %v2059_v36  ;;  %v58_v36 = vld [vmem:[#allocation2] sm:$0xff]  ;;  %v93_v34 = vld [vmem:[#allocation5 + $0x110] sm:$0xff] }
  0x22   :  { %280 = vmatpush.msra.mxu2 %v1369_v39  ;;  %328 = vmatpush.msra.mxu3 %v1359_v32  ;;  %v2067_v1 = vand.u32 4294901760, %v1460_v47  ;;  %v220_v8 = vand.u32 4294901760, %v219_v42  ;;  %v2068_v29 = vand.u32 4294901760, %v1449_v37  ;;  %v237_v42 = vsub.f32 %v1434_v13, %v2064_v48 }
  0x23   :  { %191 = vmatpush.msra.mxu1 %v190_v61  ;;  %134 = vmatpush.msra.mxu0 %v1378_v44  ;;  %v1475_v61 = vsub.f32 %v102_v38, %v1457_v43  ;;  %v1488_v31 = vsub.f32 %v99_v53, %v1472_v59  ;;  %v2072_v12 = vand.u32 4294901760, %v1464_v49  ;;  %v1498_v53 = vand.u32 4294901760, %v58_v36 }
  0x24   :  { %283 = vmatpush.msra.mxu2 %v1381_v45  ;;  %330 = vmatpush.msra.mxu3 %v1378_v44  ;;  %v232_v63 = vand.u32 4294901760, %v231_v62  ;;  %v243_v48 = vsub.f32 %v1449_v37, %v2068_v29  ;;  %v1516_v41 = vand.u32 4294901760, %v93_v34  ;;  %v1528_v33 = vand.u32 4294901760, %v90_v57 }
  0x25   :  { %197 = vmatpush.msra.mxu1 %v196_v7  ;;  %136 = vmatpush.msra.mxu0 %v1383_v46  ;;  %v96_v7 = vld [vmem:[#allocation5 + $0x128] sm:$0xff]  ;;  %v2071_v38 = vand.u32 4294901760, %v1475_v61  ;;  %v2074_v62 = vand.u32 4294901760, %v1488_v31  ;;  %v1514_v50 = vsub.f32 %v58_v36, %v1498_v53  ;;  %v249_v36 = vsub.f32 %v1464_v49, %v2072_v12 }
  0x26   :  { %286 = vmatpush.msra.mxu2 %v1393_v51  ;;  %332 = vmatpush.msra.mxu3 %v1383_v46  ;;  %v1543_v14 = vsub.f32 %v93_v34, %v1516_v41 }
  0x27   :  { %203 = vmatpush.msra.mxu1 %v202_v30  ;;  %138 = vmatpush.msra.mxu0 %v1395_v52  ;;  %v1485_v30 = vand.u32 4294901760, %v96_v7  ;;  %v512_v12 = vsub.f32 %v1488_v31, %v2074_v62  ;;  %v1540_v26 = vand.u32 4294901760, %v1514_v50  ;;  %v1553_v62 = vsub.f32 %v90_v57, %v1528_v33 }
  0x28   :  { %289 = vmatpush.msra.mxu2 %v1407_v58  ;;  %334 = vmatpush.msra.mxu3 %v1395_v52  ;;  %v2079_v57 = vand.u32 4294901760, %v1543_v14 }
  0x29   :  { %209 = vmatpush.msra.mxu1 %v208_v40  ;;  %140 = vmatpush.msra.mxu0 %v1397_v54  ;;  %v226_v40 = vand.u32 4294901760, %v225_v56  ;;  %v1506_v56 = vsub.f32 %v96_v7, %v1485_v30  ;;  %v506_v7 = vsub.f32 %v1475_v61, %v2071_v38 }
  0x2a   :  { %292 = vmatpush.msra.mxu2 %v1419_v0  ;;  %336 = vmatpush.msra.mxu3 %v1397_v54 }
  0x2b   :  { %215 = vmatpush.msra.mxu1 %v214_v55  ;;  %142 = vmatpush.msra.mxu0 %v1409_v60  ;;  %v500_v55 = vsub.f32 %v1460_v47, %v2067_v1  ;;  %v238_v1 = vand.u32 4294901760, %v237_v42  ;;  %v2075_v29 = vand.u32 4294901760, %v1506_v56  ;;  %v244_v42 = vand.u32 4294901760, %v243_v48 }
  0x2c   :  { %295 = vmatpush.msra.mxu2 %v1422_v2  ;;  %338 = vmatpush.msra.mxu3 %v1409_v60  ;;  %v250_v48 = vand.u32 4294901760, %v249_v36 }
  0x2d   :  { %221 = vmatpush.msra.mxu1 %v220_v8  ;;  %144 = vmatpush.msra.mxu0 %v1424_v6  ;;  %v87_v8 = vld [vmem:[#allocation5 + $0xe0] sm:$0xff]  ;;  %v501_v27 = vand.u32 4294901760, %v500_v55  ;;  %v518_v55 = vsub.f32 %v1506_v56, %v2075_v29  ;;  %v2080_v29 = vand.u32 4294901760, %v1328_v18 }
  0x2e   :  { %298 = vmatpush.msra.mxu2 %v1434_v13  ;;  %340 = vmatpush.msra.mxu3 %v1424_v6  ;;  %v1533_v38 = vand.u32 4294901760, %v87_v8 }
  0x2f   :  { %227 = vmatpush.msra.mxu1 %v226_v40  ;;  %146 = vmatpush.msra.mxu0 %v1436_v21  ;;  %v84_v40 = vld [vmem:[#allocation5 + $0xc8] sm:$0xff] }
  0x30   :  { %301 = vmatpush.msra.mxu2 %v1449_v37  ;;  %342 = vmatpush.msra.mxu3 %v1436_v21  ;;  %v1555_v34 = vand.u32 4294901760, %v84_v40  ;;  %v1560_v15 = vsub.f32 %v87_v8, %v1533_v38 }
  0x31   :  { %353 = vmatpush.msrb.mxu0 %v158_v22  ;;  %233 = vmatpush.msra.mxu1 %v232_v63  ;;  %v507_v22 = vand.u32 4294901760, %v506_v7  ;;  %v81_v63 = vld [vmem:[#allocation5 + $0xb0] sm:$0xff]  ;;  %v150_v7 = vsub.f32 %v1514_v50, %v1540_v26 }
  0x32   :  { %304 = vmatpush.msra.mxu2 %v1464_v49  ;;  %502 = vmatpush.msrb.mxu3 %v501_v27  ;;  %v1566_v36 = vand.u32 4294901760, %v81_v63  ;;  %v2077_v27 = vand.u32 4294901760, %v1553_v62  ;;  %v2076_v18 = vand.u32 4294901760, %v1560_v15 }
  0x33   :  { %357 = vmatpush.msrb.mxu0 %v164_v23  ;;  %239 = vmatpush.msra.mxu1 %v238_v1  ;;  %v78_v23 = vld [vmem:[#allocation5 + $0x98] sm:$0xff]  ;;  %v513_v1 = vand.u32 4294901760, %v512_v12  ;;  %v1573_v12 = vsub.f32 %v84_v40, %v1555_v34 }
  0x34   :  { %457 = vmatpush.msrb.mxu2 %v1445_v35  ;;  %508 = vmatpush.msrb.mxu3 %v507_v22  ;;  %v1575_v8 = vand.u32 4294901760, %v78_v23  ;;  %v524_v22 = vsub.f32 %v1543_v14, %v2079_v57  ;;  %v1588_v40 = vsub.f32 %v81_v63, %v1566_v36  ;;  %v63_v57 = vld [vmem:[#allocation5 + $0x20] sm:$0xff] }
  0x35   :  { %361 = vmatpush.msrb.mxu0 %v170_v24  ;;  %245 = vmatpush.msra.mxu1 %v244_v42  ;;  %v519_v24 = vand.u32 4294901760, %v518_v55  ;;  %v2081_v42 = vand.u32 4294901760, %v1331_v19  ;;  %v72_v19 = vld [vmem:[#allocation5 + $0x68] sm:$0xff]  ;;  %v530_v55 = vsub.f32 %v1553_v62, %v2077_v27 }
  0x36   :  { %459 = vmatpush.msrb.mxu2 %v1457_v43  ;;  %514 = vmatpush.msrb.mxu3 %v513_v1  ;;  %v2078_v1 = vand.u32 4294901760, %v1573_v12  ;;  %v1601_v63 = vsub.f32 %v78_v23, %v1575_v8 }
  0x37   :  { %365 = vmatpush.msrb.mxu0 %v2080_v29  ;;  %251 = vmatpush.msra.mxu1 %v250_v48  ;;  %v1582_v29 = vand.u32 4294901760, %v150_v7  ;;  %v1590_v48 = vand.u32 4294901760, %v75_v16  ;;  %v69_v7 = vld [vmem:[#allocation5 + $0x50] sm:$0xff] }
  0x38   :  { %461 = vmatpush.msrb.mxu2 %v1472_v59  ;;  %520 = vmatpush.msrb.mxu3 %v519_v24  ;;  %v525_v24 = vand.u32 4294901760, %v524_v22  ;;  %v542_v22 = vsub.f32 %v1573_v12, %v2078_v1  ;;  %v1626_v27 = vand.u32 4294901760, %v69_v7 }
  0x39   :  { %420 = vmatpush.msrb.mxu1 %v1302_v3  ;;  %369 = vmatpush.msrb.mxu0 %v2081_v42  ;;  %v2082_v3 = vand.u32 4294901760, %v1334_v20  ;;  %v536_v20 = vsub.f32 %v1560_v15, %v2076_v18  ;;  %v547_v42 = vand.u32 4294901760, %v1588_v40  ;;  %v1615_v23 = vsub.f32 %v75_v16, %v1590_v48 }
  0x3a   :  { %463 = vmatpush.msrb.mxu2 %v1485_v30  ;;  %152 = vmatmul.f32.vlgmr.msra.gmra.mxu0 %v1582_v29  ;;  %v553_v18 = vand.u32 4294901760, %v1601_v63 }
  0x3b   :  { %422 = vmatpush.msrb.mxu1 %v1304_v4  ;;  %373 = vmatpush.msrb.mxu0 %v2082_v3  ;;  %v2083_v4 = vand.u32 4294901760, %v1346_v28  ;;  %v1612_v3 = vand.u32 4294901760, %v72_v19  ;;  %v66_v28 = vld [vmem:[#allocation5 + $0x38] sm:$0xff]  ;;  %v548_v16 = vsub.f32 %v1588_v40, %v547_v42 }
  0x3c   :  { %307 = vmatmul.f32.vlgmr.msra.gmra.mxu2 %v1514_v50  ;;  %346 = vmatmul.f32.vlgmr.msra.gmra.mxu3 %v1540_v26  ;;  %v1639_v1 = vand.u32 4294901760, %v66_v28 }
  0x3d   :  { %424 = vmatpush.msrb.mxu1 %v1306_v5  ;;  %377 = vmatpush.msrb.mxu0 %v2083_v4  ;;  %v2084_v5 = vand.u32 4294901760, %v1369_v39  ;;  %v531_v4 = vand.u32 4294901760, %v530_v55  ;;  %v537_v39 = vand.u32 4294901760, %v536_v20  ;;  %v559_v55 = vand.u32 4294901760, %v1615_v23 }
  0x3e   :  { %465 = vmatpush.msrb.mxu2 %v1516_v41  ;;  %526 = vmatpush.msrb.mxu3 %v525_v24  ;;  %v554_v20 = vsub.f32 %v1601_v63, %v553_v18  ;;  %v1649_v24 = vsub.f32 %v69_v7, %v1626_v27  ;;  %v1662_v7 = vsub.f32 %v66_v28, %v1639_v1 }
  0x3f   :  { %426 = vmatpush.msrb.mxu1 %v1308_v9  ;;  %381 = vmatpush.msrb.mxu0 %v2084_v5  ;;  %v2085_v9 = vand.u32 4294901760, %v1381_v45  ;;  %v1637_v5 = vsub.f32 %v72_v19, %v1612_v3  ;;  %v543_v45 = vand.u32 4294901760, %v542_v22  ;;  %v60_v19 = vld [vmem:[#allocation5 + $0x8] sm:$0xff] }
  0x40   :  { %467 = vmatpush.msrb.mxu2 %v1528_v33  ;;  %253 = vmatmul.f32.vlgmr.msra.gmra.mxu1 %v1498_v53 }
  0x41   :  { %428 = vmatpush.msrb.mxu1 %v1310_v10  ;;  %385 = vmatpush.msrb.mxu0 %v2085_v9  ;;  %v2086_v10 = vand.u32 4294901760, %v1393_v51  ;;  %v2087_v9 = vand.u32 4294901760, %v1407_v58  ;;  %v549_v51 = vand.u32 4294901760, %v548_v16  ;;  %v565_v22 = vand.u32 4294901760, %v1637_v5 }
  0x42   :  { %469 = vmatpush.msrb.mxu2 %v1533_v38  ;;  %532 = vmatpush.msrb.mxu3 %v531_v4  ;;  %v560_v4 = vsub.f32 %v1615_v23, %v559_v55  ;;  %v1667_v58 = vand.u32 4294901760, %v60_v19  ;;  %v571_v16 = vand.u32 4294901760, %v1649_v24 }
  0x43   :  { %430 = vmatpush.msrb.mxu1 %v1312_v11  ;;  %389 = vmatpush.msrb.mxu0 %v2086_v10  ;;  %v1654_v11 = vand.u32 4294901760, %v63_v57  ;;  %v2089_v10 = vand.u32 4294901760, %v1422_v2 }
  0x44   :  { %471 = vmatpush.msrb.mxu2 %v1555_v34  ;;  %538 = vmatpush.msrb.mxu3 %v537_v39  ;;  %v555_v39 = vand.u32 4294901760, %v554_v20  ;;  %v1686_v2 = vsub.f32 %v60_v19, %v1667_v58  ;;  %v2091_v20 = vand.u32 4294901760, %v1449_v37 }
  0x45   :  { %432 = vmatpush.msrb.mxu1 %v1324_v17  ;;  %393 = vmatpush.msrb.mxu0 %v2087_v9  ;;  %v2088_v17 = vand.u32 4294901760, %v1419_v0  ;;  %v1675_v28 = vsub.f32 %v63_v57, %v1654_v11  ;;  %v566_v0 = vsub.f32 %v1637_v5, %v565_v22  ;;  %v572_v57 = vsub.f32 %v1649_v24, %v571_v16 }
  0x46   :  { %473 = vmatpush.msrb.mxu2 %v1566_v36  ;;  %544 = vmatpush.msrb.mxu3 %v543_v45  ;;  %v577_v45 = vand.u32 4294901760, %v1662_v7  ;;  %v2092_v9 = vand.u32 4294901760, %v1464_v49 }
  0x47   :  { %434 = vmatpush.msrb.mxu1 %v1340_v25  ;;  %397 = vmatpush.msrb.mxu0 %v2088_v17  ;;  %v561_v25 = vand.u32 4294901760, %v560_v4  ;;  %v573_v37 = vand.u32 4294901760, %v572_v57  ;;  %v2095_v4 = vand.u32 4294901760, %v1488_v31  ;;  %v2096_v17 = vand.u32 4294901760, %v1506_v56 }
  0x48   :  { %475 = vmatpush.msrb.mxu2 %v1575_v8  ;;  %550 = vmatpush.msrb.mxu3 %v549_v51  ;;  %v578_v19 = vsub.f32 %v1662_v7, %v577_v45 }
  0x49   :  { %436 = vmatpush.msrb.mxu1 %v1359_v32  ;;  %401 = vmatpush.msrb.mxu0 %v2089_v10  ;;  %v2090_v32 = vand.u32 4294901760, %v1434_v13  ;;  %v567_v13 = vand.u32 4294901760, %v566_v0 }
  0x4a   :  { %477 = vmatpush.msrb.mxu2 %v1590_v48  ;;  %556 = vmatpush.msrb.mxu3 %v555_v39  ;;  %v2099_v39 = vand.u32 4294901760, %v1560_v15 }
  0x4b   :  { %438 = vmatpush.msrb.mxu1 %v1378_v44  ;;  %405 = vmatpush.msrb.mxu0 %v2090_v32  ;;  %v583_v44 = vand.u32 4294901760, %v1675_v28  ;;  %v88_v32 = vld [vmem:[#allocation5 + $0xe8] sm:$0xff] }
  0x4c   :  { %479 = vmatpush.msrb.mxu2 %v1612_v3  ;;  %562 = vmatpush.msrb.mxu3 %v561_v25 }
  0x4d   :  { %440 = vmatpush.msrb.mxu1 %v1383_v46  ;;  %409 = vmatpush.msrb.mxu0 %v2091_v20  ;;  %v589_v46 = vand.u32 4294901760, %v1686_v2  ;;  %v584_v51 = vsub.f32 %v1675_v28, %v583_v44  ;;  %v1803_v20 = vand.u32 4294901760, %v88_v32 }
  0x4e   :  { %481 = vmatpush.msrb.mxu2 %v1626_v27  ;;  %568 = vmatpush.msrb.mxu3 %v567_v13 }
  0x4f   :  { %442 = vmatpush.msrb.mxu1 %v1395_v52  ;;  %413 = vmatpush.msrb.mxu0 %v2092_v9  ;;  %v579_v52 = vand.u32 4294901760, %v578_v19  ;;  %v590_v49 = vsub.f32 %v1686_v2, %v589_v46  ;;  %v82_v19 = vld [vmem:[#allocation5 + $0xb8] sm:$0xff] }
  0x50   :  { %415 = vmatmul.f32.vlgmr.msrb.gmra.mxu0 %v1498_v53  ;;  %483 = vmatpush.msrb.mxu2 %v1639_v1 }
  0x51   :  { %600 = vmatpush.msra.mxu0 %v1460_v47  ;;  %444 = vmatpush.msrb.mxu1 %v1397_v54  ;;  %v585_v54 = vand.u32 4294901760, %v584_v51 }
  0x52   :  { %574 = vmatpush.msrb.mxu3 %v573_v37  ;;  %485 = vmatpush.msrb.mxu2 %v1654_v11 }
  0x53   :  { %603 = vmatpush.msra.mxu0 %v1475_v61  ;;  %446 = vmatpush.msrb.mxu1 %v1409_v60  ;;  %v591_v60 = vand.u32 4294901760, %v590_v49  ;;  %v76_v49 = vld [vmem:[#allocation5 + $0x88] sm:$0xff] }
  0x54   :  { %580 = vmatpush.msrb.mxu3 %v579_v52  ;;  %487 = vmatpush.msrb.mxu2 %v1667_v58 }
  0x55   :  { %606 = vmatpush.msra.mxu0 %v1488_v31  ;;  %448 = vmatpush.msrb.mxu1 %v1424_v6  ;;  %v2093_v6 = vand.u32 4294901760, %v1460_v47  ;;  %v106_v47 = vld [vmem:[#allocation5 + $0x178] sm:$0xff]  ;;  %v100_v31 = vld [vmem:[#allocation5 + $0x148] sm:$0xff] }
  0x56   :  { %586 = vmatpush.msrb.mxu3 %v585_v54  ;;  %v1767_v10 = vand.u32 4294901760, %v100_v31  ;;  %493 = vmatmul.f32.vlgmr.msrb.gmra.mxu2 %v1582_v29 }
  0x57   :  { %609 = vmatpush.msra.mxu0 %v1506_v56  ;;  %450 = vmatpush.msrb.mxu1 %v1436_v21  ;;  %v2094_v21 = vand.u32 4294901760, %v1475_v61  ;;  %v2097_v61 = vand.u32 4294901760, %v1543_v14  ;;  %v2098_v56 = vand.u32 4294901760, %v1553_v62 }
  0x58   :  { %452 = vmatmul.f32.vlgmr.msrb.gmra.mxu1 %v1498_v53  ;;  %694 = vmatpush.msra.mxu2 %v2093_v6  ;;  %v73_v6 = vld [vmem:[#allocation5 + $0x70] sm:$0xff] }
  0x59   :  { %653 = vmatpush.msra.mxu1 %v1445_v35  ;;  %612 = vmatpush.msra.mxu0 %v1543_v14  ;;  %v97_v14 = vld [vmem:[#allocation5 + $0x130] sm:$0xff] }
  0x5a   :  { %592 = vmatpush.msrb.mxu3 %v591_v60  ;;  %698 = vmatpush.msra.mxu2 %v2094_v21  ;;  %v1777_v0 = vand.u32 4294901760, %v97_v14 }
  0x5b   :  { %655 = vmatpush.msra.mxu1 %v1457_v43  ;;  %615 = vmatpush.msra.mxu0 %v1553_v62  ;;  %v2100_v62 = vand.u32 4294901760, %v1573_v12 }
  0x5c   :  { %761 = vmatpush.msra.mxu3 %v1445_v35  ;;  %702 = vmatpush.msra.mxu2 %v2095_v4  ;;  %v103_v35 = vld [vmem:[#allocation5 + $0x160] sm:$0xff] }
  0x5d   :  { %657 = vmatpush.msra.mxu1 %v1472_v59  ;;  %618 = vmatpush.msra.mxu0 %v1560_v15 }
  0x5e   :  { %763 = vmatpush.msra.mxu3 %v1457_v43  ;;  %706 = vmatpush.msra.mxu2 %v2096_v17  ;;  %v1750_v43 = vand.u32 4294901760, %v106_v47 }
  0x5f   :  { %659 = vmatpush.msra.mxu1 %v1485_v30  ;;  %621 = vmatpush.msra.mxu0 %v1573_v12  ;;  %v1786_v12 = vsub.f32 %v100_v31, %v1767_v10  ;;  %v1880_v31 = vand.u32 4294901760, %v73_v6 }
  0x60   :  { %765 = vmatpush.msra.mxu3 %v1472_v59  ;;  %710 = vmatpush.msra.mxu2 %v2097_v61  ;;  %v1757_v59 = vand.u32 4294901760, %v103_v35 }
  0x61   :  { %661 = vmatpush.msra.mxu1 %v1516_v41  ;;  %624 = vmatpush.msra.mxu0 %v1588_v40  ;;  %v1797_v40 = vsub.f32 %v97_v14, %v1777_v0 }
  0x62   :  { %767 = vmatpush.msra.mxu3 %v1485_v30  ;;  %714 = vmatpush.msra.mxu2 %v2098_v56  ;;  %v1762_v30 = vsub.f32 %v106_v47, %v1750_v43  ;;  %v1775_v25 = vsub.f32 %v103_v35, %v1757_v59 }
  0x63   :  { %663 = vmatpush.msra.mxu1 %v1528_v33  ;;  %627 = vmatpush.msra.mxu0 %v1601_v63  ;;  %v858_v37 = vand.u32 4294901760, %v1797_v40 }
  0x64   :  { %769 = vmatpush.msra.mxu3 %v1516_v41  ;;  %718 = vmatpush.msra.mxu2 %v2099_v39  ;;  %v94_v41 = vld [vmem:[#allocation5 + $0x118] sm:$0xff]  ;;  %v840_v15 = vand.u32 4294901760, %v1762_v30  ;;  %v846_v57 = vand.u32 4294901760, %v1775_v25 }
  0x65   :  { %665 = vmatpush.msra.mxu1 %v1533_v38  ;;  %630 = vmatpush.msra.mxu0 %v1615_v23  ;;  %v859_v60 = vsub.f32 %v1797_v40, %v858_v37 }
  0x66   :  { %771 = vmatpush.msra.mxu3 %v1528_v33  ;;  %722 = vmatpush.msra.mxu2 %v2100_v62  ;;  %v91_v33 = vld [vmem:[#allocation5 + $0x100] sm:$0xff]  ;;  %v847_v9 = vsub.f32 %v1775_v25, %v846_v57  ;;  %v1903_v62 = vsub.f32 %v73_v6, %v1880_v31 }
  0x67   :  { %667 = vmatpush.msra.mxu1 %v1555_v34  ;;  %633 = vmatpush.msra.mxu0 %v1637_v5  ;;  %v860_v17 = vand.u32 4294901760, %v859_v60 }
  0x68   :  { %773 = vmatpush.msra.mxu3 %v1533_v38  ;;  %726 = vmatpush.msra.mxu2 %v547_v42  ;;  %v1788_v38 = vand.u32 4294901760, %v94_v41  ;;  %v85_v42 = vld [vmem:[#allocation5 + $0xd0] sm:$0xff]  ;;  %v848_v54 = vand.u32 4294901760, %v847_v9 }
  0x69   :  { %669 = vmatpush.msra.mxu1 %v1566_v36  ;;  %636 = vmatpush.msra.mxu0 %v1649_v24  ;;  %v1817_v13 = vand.u32 4294901760, %v85_v42 }
  0x6a   :  { %775 = vmatpush.msra.mxu3 %v1555_v34  ;;  %730 = vmatpush.msra.mxu2 %v553_v18  ;;  %v1799_v34 = vand.u32 4294901760, %v91_v33  ;;  %v841_v18 = vsub.f32 %v1762_v30, %v840_v15  ;;  %v1813_v63 = vsub.f32 %v94_v41, %v1788_v38 }
  0x6b   :  { %671 = vmatpush.msra.mxu1 %v1575_v8  ;;  %639 = vmatpush.msra.mxu0 %v1662_v7 }
  0x6c   :  { %777 = vmatpush.msra.mxu3 %v1566_v36  ;;  %v852_v36 = vand.u32 4294901760, %v1786_v12  ;;  %734 = vmatpush.msra.mxu2 %v559_v55  ;;  %v1827_v23 = vsub.f32 %v91_v33, %v1799_v34  ;;  %v79_v55 = vld [vmem:[#allocation5 + $0xa0] sm:$0xff]  ;;  %v842_v51 = vand.u32 4294901760, %v841_v18  ;;  %v864_v5 = vand.u32 4294901760, %v1813_v63 }
  0x6d   :  { %673 = vmatpush.msra.mxu1 %v1590_v48  ;;  %642 = vmatpush.msra.mxu0 %v1675_v28 }
  0x6e   :  { %779 = vmatpush.msra.mxu3 %v1575_v8  ;;  %738 = vmatpush.msra.mxu2 %v565_v22  ;;  %v1832_v8 = vsub.f32 %v88_v32, %v1803_v20  ;;  %v853_v52 = vsub.f32 %v1786_v12, %v852_v36  ;;  %v1841_v22 = vand.u32 4294901760, %v82_v19  ;;  %v870_v24 = vand.u32 4294901760, %v1827_v23 }
  0x6f   :  { %675 = vmatpush.msra.mxu1 %v1612_v3  ;;  %645 = vmatpush.msra.mxu0 %v1686_v2  ;;  %v865_v4 = vsub.f32 %v1813_v63, %v864_v5 }
  0x70   :  { %781 = vmatpush.msra.mxu3 %v1590_v48  ;;  %742 = vmatpush.msra.mxu2 %v571_v16  ;;  %v1846_v48 = vsub.f32 %v85_v42, %v1817_v13  ;;  %v1855_v16 = vand.u32 4294901760, %v79_v55  ;;  %v854_v21 = vand.u32 4294901760, %v853_v52  ;;  %v1865_v7 = vsub.f32 %v82_v19, %v1841_v22  ;;  %v61_v42 = vld [vmem:[#allocation5 + $0x10] sm:$0xff] }
  0x71   :  { %798 = vmatpush.msrb.mxu0 %v1750_v43  ;;  %677 = vmatpush.msra.mxu1 %v1626_v27  ;;  %v871_v35 = vsub.f32 %v1827_v23, %v870_v24  ;;  %v906_v52 = vand.u32 4294901760, %v1903_v62 }
  0x72   :  { %783 = vmatpush.msra.mxu3 %v1612_v3  ;;  %746 = vmatpush.msra.mxu2 %v577_v45  ;;  %v876_v3 = vand.u32 4294901760, %v1832_v8  ;;  %v1867_v45 = vand.u32 4294901760, %v76_v49  ;;  %v882_v47 = vand.u32 4294901760, %v1846_v48  ;;  %v1878_v61 = vsub.f32 %v79_v55, %v1855_v16 }
  0x73   :  { %800 = vmatpush.msrb.mxu0 %v1757_v59  ;;  %679 = vmatpush.msra.mxu1 %v1639_v1  ;;  %v888_v56 = vand.u32 4294901760, %v1865_v7  ;;  %v872_v2 = vand.u32 4294901760, %v871_v35 }
  0x74   :  { %785 = vmatpush.msra.mxu3 %v1626_v27  ;;  %750 = vmatpush.msra.mxu2 %v583_v44  ;;  %v70_v27 = vld [vmem:[#allocation5 + $0x58] sm:$0xff]  ;;  %v877_v28 = vsub.f32 %v1832_v8, %v876_v3  ;;  %v866_v44 = vand.u32 4294901760, %v865_v4  ;;  %v1891_v14 = vsub.f32 %v76_v49, %v1867_v45  ;;  %v883_v41 = vsub.f32 %v1846_v48, %v882_v47 }
  0x75   :  { %802 = vmatpush.msrb.mxu0 %v1767_v10  ;;  %681 = vmatpush.msra.mxu1 %v1654_v11  ;;  %v1893_v39 = vand.u32 4294901760, %v70_v27 }
  0x76   :  { %787 = vmatpush.msra.mxu3 %v1639_v1  ;;  %754 = vmatpush.msra.mxu2 %v589_v46  ;;  %v67_v1 = vld [vmem:[#allocation5 + $0x40] sm:$0xff]  ;;  %v894_v46 = vand.u32 4294901760, %v1878_v61  ;;  %v878_v32 = vand.u32 4294901760, %v877_v28  ;;  %v900_v18 = vand.u32 4294901760, %v1891_v14  ;;  %v884_v55 = vand.u32 4294901760, %v883_v41 }
  0x77   :  { %804 = vmatpush.msrb.mxu0 %v1777_v0  ;;  %683 = vmatpush.msra.mxu1 %v1667_v58  ;;  %v1905_v33 = vand.u32 4294901760, %v67_v1  ;;  %v1915_v19 = vsub.f32 %v70_v27, %v1893_v39 }
  0x78   :  { %789 = vmatpush.msra.mxu3 %v1654_v11  ;;  %v64_v11 = vld [vmem:[#allocation5 + $0x28] sm:$0xff]  ;;  %941 = vmatpush.msrb.mxu2 %v1762_v30  ;;  %v901_v6 = vsub.f32 %v1891_v14, %v900_v18 }
  0x79   :  { %843 = vmatpush.msrb.mxu1 %v842_v51  ;;  %806 = vmatpush.msrb.mxu0 %v1788_v38  ;;  %v1917_v9 = vand.u32 4294901760, %v64_v11  ;;  %v895_v51 = vsub.f32 %v1878_v61, %v894_v46  ;;  %v1927_v49 = vsub.f32 %v67_v1, %v1905_v33 }
  0x7a   :  { %791 = vmatpush.msra.mxu3 %v1667_v58  ;;  %v889_v58 = vsub.f32 %v1865_v7, %v888_v56  ;;  %944 = vmatpush.msrb.mxu2 %v1775_v25  ;;  %v902_v1 = vand.u32 4294901760, %v901_v6 }
  0x7b   :  { %849 = vmatpush.msrb.mxu1 %v848_v54  ;;  %808 = vmatpush.msrb.mxu0 %v1799_v34  ;;  %v1929_v54 = vand.u32 4294901760, %v61_v42  ;;  %v1939_v4 = vsub.f32 %v64_v11, %v1917_v9  ;;  %v896_v27 = vand.u32 4294901760, %v895_v51  ;;  %v918_v35 = vand.u32 4294901760, %v1927_v49 }
  0x7c   :  { %594 = vmatmul.f32.vlgmr.msrb.gmra.mxu3 %v1498_v53  ;;  %947 = vmatpush.msrb.mxu2 %v1786_v12  ;;  %v890_v60 = vand.u32 4294901760, %v889_v58 }
  0x7d   :  { %855 = vmatpush.msrb.mxu1 %v854_v21  ;;  %810 = vmatpush.msrb.mxu0 %v1803_v20  ;;  %v912_v21 = vand.u32 4294901760, %v1915_v19  ;;  %v1949_v28 = vsub.f32 %v61_v42, %v1929_v54  ;;  %v924_v41 = vand.u32 4294901760, %v1939_v4 }
  0x7e   :  { %994 = vmatpush.msrb.mxu3 %v1750_v43  ;;  %950 = vmatpush.msrb.mxu2 %v1797_v40 }
  0x7f   :  { %861 = vmatpush.msrb.mxu1 %v860_v17  ;;  %812 = vmatpush.msrb.mxu0 %v1817_v13  ;;  %v907_v17 = vsub.f32 %v1903_v62, %v906_v52  ;;  %v925_v58 = vsub.f32 %v1939_v4, %v924_v41 }
  0x80   :  { %996 = vmatpush.msrb.mxu3 %v1757_v59  ;;  %756 = vmatmul.f32.vlgmr.msra.gmra.mxu2 %v1498_v53 }
  0x81   :  { %867 = vmatpush.msrb.mxu1 %v866_v44  ;;  %814 = vmatpush.msrb.mxu0 %v1841_v22  ;;  %v913_v44 = vsub.f32 %v1915_v19, %v912_v21  ;;  %v908_v11 = vand.u32 4294901760, %v907_v17 }
  0x82   :  { %998 = vmatpush.msrb.mxu3 %v1767_v10  ;;  %953 = vmatpush.msrb.mxu2 %v1813_v63 }
  0x83   :  { %873 = vmatpush.msrb.mxu1 %v872_v2  ;;  %816 = vmatpush.msrb.mxu0 %v1855_v16  ;;  %v919_v2 = vsub.f32 %v1927_v49, %v918_v35  ;;  %v914_v42 = vand.u32 4294901760, %v913_v44 }
  0x84   :  { %1000 = vmatpush.msrb.mxu3 %v1777_v0  ;;  %648 = vmatmul.f32.vlgmr.msra.gmra.mxu0 %v1514_v50 }
  0x85   :  { %879 = vmatpush.msrb.mxu1 %v878_v32  ;;  %818 = vmatpush.msrb.mxu0 %v1867_v45  ;;  %v930_v32 = vand.u32 4294901760, %v1949_v28 }
  0x86   :  { %793 = vmatmul.f32.vlgmr.msra.gmra.mxu3 %v1498_v53  ;;  %956 = vmatpush.msrb.mxu2 %v1827_v23 }
  0x87   :  { %885 = vmatpush.msrb.mxu1 %v884_v55  ;;  %820 = vmatpush.msrb.mxu0 %v1880_v31  ;;  %v920_v55 = vand.u32 4294901760, %v919_v2  ;;  %v931_v51 = vsub.f32 %v1949_v28, %v930_v32 }
  0x88   :  { %1002 = vmatpush.msrb.mxu3 %v1788_v38  ;;  %687 = vmatmul.f32.vlgmr.msra.gmra.mxu1 %v1540_v26 }
  0x89   :  { %891 = vmatpush.msrb.mxu1 %v890_v60  ;;  %822 = vmatpush.msrb.mxu0 %v1893_v39  ;;  %v926_v60 = vand.u32 4294901760, %v925_v58  ;;  %v932_v6 = vand.u32 4294901760, %v931_v51 }
  0x8a   :  { %959 = vmatpush.msrb.mxu2 %v1832_v8  ;;  %1004 = vmatpush.msrb.mxu3 %v1799_v34 }
  0x8b   :  { %897 = vmatpush.msrb.mxu1 %v896_v27  ;;  %824 = vmatpush.msrb.mxu0 %v1905_v33 }
  0x8c   :  { %962 = vmatpush.msrb.mxu2 %v1846_v48  ;;  %1006 = vmatpush.msrb.mxu3 %v1803_v20 }
  0x8d   :  { %903 = vmatpush.msrb.mxu1 %v902_v1  ;;  %826 = vmatpush.msrb.mxu0 %v1917_v9 }
  0x8e   :  { %965 = vmatpush.msrb.mxu2 %v1865_v7  ;;  %1008 = vmatpush.msrb.mxu3 %v1817_v13 }
  0x8f   :  { %909 = vmatpush.msrb.mxu1 %v908_v11  ;;  %828 = vmatpush.msrb.mxu0 %v1929_v54 }
  0x90   :  { %968 = vmatpush.msrb.mxu2 %v1878_v61  ;;  %1010 = vmatpush.msrb.mxu3 %v1841_v22 }
  0x91   :  { %1035 = vmatpush.msra.mxu0 %v840_v15  ;;  %915 = vmatpush.msrb.mxu1 %v914_v42 }
  0x92   :  { %971 = vmatpush.msrb.mxu2 %v1891_v14  ;;  %1012 = vmatpush.msrb.mxu3 %v1855_v16 }
  0x93   :  { %1039 = vmatpush.msra.mxu0 %v846_v57  ;;  %921 = vmatpush.msrb.mxu1 %v920_v55 }
  0x94   :  { %974 = vmatpush.msrb.mxu2 %v1903_v62  ;;  %1014 = vmatpush.msrb.mxu3 %v1867_v45 }
  0x95   :  { %1043 = vmatpush.msra.mxu0 %v852_v36  ;;  %927 = vmatpush.msrb.mxu1 %v926_v60 }
  0x96   :  { %977 = vmatpush.msrb.mxu2 %v1915_v19  ;;  %1016 = vmatpush.msrb.mxu3 %v1880_v31 }
  0x97   :  { %1047 = vmatpush.msra.mxu0 %v858_v37  ;;  %933 = vmatpush.msrb.mxu1 %v932_v6 }
  0x98   :  { %980 = vmatpush.msrb.mxu2 %v1927_v49  ;;  %1018 = vmatpush.msrb.mxu3 %v1893_v39 }
  0x99   :  { %1102 = vmatpush.msra.mxu1 %v1750_v43  ;;  %1051 = vmatpush.msra.mxu0 %v864_v5 }
  0x9a   :  { %983 = vmatpush.msrb.mxu2 %v1939_v4  ;;  %1020 = vmatpush.msrb.mxu3 %v1905_v33 }
  0x9b   :  { %1104 = vmatpush.msra.mxu1 %v1757_v59  ;;  %1055 = vmatpush.msra.mxu0 %v870_v24 }
  0x9c   :  { %986 = vmatpush.msrb.mxu2 %v1949_v28  ;;  %1022 = vmatpush.msrb.mxu3 %v1917_v9 }
  0x9d   :  { %1106 = vmatpush.msra.mxu1 %v1767_v10  ;;  %1059 = vmatpush.msra.mxu0 %v876_v3 }
  0x9e   :  { %989 = vmatmul.f32.vlgmr.msrb.gmra.mxu2 %v1514_v50  ;;  %1024 = vmatpush.msrb.mxu3 %v1929_v54 }
  0x9f   :  { %1108 = vmatpush.msra.mxu1 %v1777_v0  ;;  %1063 = vmatpush.msra.mxu0 %v882_v47 }
  0xa0   :  { %834 = vmatmul.f32.vlgmr.msrb.gmra.mxu0 %v1582_v29  ;;  %1028 = vmatmul.f32.vlgmr.msrb.gmra.mxu3 %v1540_v26  ;;  %v107_v26 = vld [vmem:[#allocation7] sm:$0x7] }
  0xa1   :  { %1110 = vmatpush.msra.mxu1 %v1788_v38  ;;  %1067 = vmatpush.msra.mxu0 %v888_v56  ;;  %v109_v50 = vperm.slane %v107_v26, 0 }
  0xa2   :  { %935 = vmatmul.f32.vlgmr.msrb.gmra.mxu1 %v1498_v53 }
  0xa3   :  { %1112 = vmatpush.msra.mxu1 %v1799_v34  ;;  %1071 = vmatpush.msra.mxu0 %v894_v46  ;;  %v110_v34 = vperm.slane %v107_v26, 1 }
  0xa5   :  { %1114 = vmatpush.msra.mxu1 %v1803_v20  ;;  %1075 = vmatpush.msra.mxu0 %v900_v18 }
  0xa7   :  { %1116 = vmatpush.msra.mxu1 %v1817_v13  ;;  %1079 = vmatpush.msra.mxu0 %v906_v52 }
  0xa9   :  { %1118 = vmatpush.msra.mxu1 %v1841_v22  ;;  %1083 = vmatpush.msra.mxu0 %v912_v21 }
  0xab   :  { %1120 = vmatpush.msra.mxu1 %v1855_v16  ;;  %1087 = vmatpush.msra.mxu0 %v918_v35  ;;  %v111_v16 = vperm.slane %v107_v26, 2 }
  0xad   :  { %1122 = vmatpush.msra.mxu1 %v1867_v45  ;;  %1091 = vmatpush.msra.mxu0 %v924_v41 }
  0xaf   :  { %1124 = vmatpush.msra.mxu1 %v1880_v31  ;;  %1095 = vmatpush.msra.mxu0 %v930_v32 }
  0xb0   :  { %1097 = vmatmul.f32.vlgmr.msra.gmra.mxu0 %v1498_v53 }
  0xb1   :  { %1126 = vmatpush.msra.mxu1 %v1893_v39 }
  0xb3   :  { %1128 = vmatpush.msra.mxu1 %v1905_v33 }
  0xb5   :  { %1130 = vmatpush.msra.mxu1 %v1917_v9 }
  0xb7   :  { %1132 = vmatpush.msra.mxu1 %v1929_v54  ;;  %v153_v29 = vpop.f32.mrf.mxu0 }
  0xb8   :  { %1134 = vmatmul.f32.vlgmr.msra.gmra.mxu1 %v1498_v53  ;;  %v154_v43 = vadd.f32 %v153_v29, %v109_v50 }
  0xbd   :  { %v254_v59 = vpop.f32.mrf.mxu1 }
  0xbe   :  { %v255_v30 = vadd.f32 %v254_v59, %v154_v43 }
  0xbf   :  { %v308_v10 = vpop.f32.mrf.mxu2  ;;  %v347_v0 = vpop.f32.mrf.mxu3 }
  0xc0   :  { %v309_v25 = vadd.f32 %v308_v10, %v255_v30 }
  0xc2   :  { %v348_v15 = vadd.f32 %v347_v0, %v309_v25 }
  0xcd   :  { %v416_v12 = vpop.f32.mrf.mxu0 }
  0xce   :  { %v417_v38 = vadd.f32 %v416_v12, %v348_v15 }
  0xd5   :  { %v453_v57 = vpop.f32.mrf.mxu1 }
  0xd6   :  { %v454_v40 = vadd.f32 %v453_v57, %v417_v38 }
  0xd8   :  { %1138 = vst [vmem:[#allocation8] sm:$0xff] %v454_v40 }
  0xd9   :  { %v494_v20 = vpop.f32.mrf.mxu2 }
  0xda   :  { %v495_v36 = vadd.f32 %v494_v20, %v110_v34 }
  0xff   :  { %v595_v63 = vpop.f32.mrf.mxu3 }
 0x100   :  { %v596_v53 = vadd.f32 %v595_v63, %v495_v36 }
 0x101   :  { %v649_v13 = vpop.f32.mrf.mxu0 }
 0x102   :  { %v650_v37 = vadd.f32 %v649_v13, %v596_v53 }
 0x103   :  { %v757_v8 = vpop.f32.mrf.mxu2 }
 0x105   :  { %v688_v23 = vpop.f32.mrf.mxu1 }
 0x106   :  { %v689_v5 = vadd.f32 %v688_v23, %v650_v37 }
 0x108   :  { %v758_v22 = vadd.f32 %v757_v8, %v689_v5 }
 0x109   :  { %v794_v48 = vpop.f32.mrf.mxu3 }
 0x10a   :  { %v795_v24 = vadd.f32 %v794_v48, %v758_v22 }
 0x10c   :  { %1139 = vst [vmem:[#allocation8 + $0x8] sm:$0xff] %v795_v24 }
 0x11d   :  { %v835_v3 = vpop.f32.mrf.mxu0 }
 0x11e   :  { %v836_v7 = vadd.f32 %v835_v3, %v111_v16 }
 0x11f   :  { %v936_v45 = vpop.f32.mrf.mxu1 }
 0x120   :  { %v937_v47 = vadd.f32 %v936_v45, %v836_v7 }
 0x121   :  { %v990_v61 = vpop.f32.mrf.mxu2 }
 0x122   :  { %v991_v31 = vadd.f32 %v990_v61, %v937_v47 }
 0x123   :  { %v1029_v56 = vpop.f32.mrf.mxu3 }
 0x124   :  { %v1030_v14 = vadd.f32 %v1029_v56, %v991_v31 }
 0x12d   :  { %v1098_v39 = vpop.f32.mrf.mxu0 }
 0x12e   :  { %v1099_v46 = vadd.f32 %v1098_v39, %v1030_v14 }
 0x135   :  { %v1135_v62 = vpop.f32.mrf.mxu1 }
 0x136   :  { %v1136_v33 = vadd.f32 %v1135_v62, %v1099_v46 }
 0x138   :  { %1140 = vst [vmem:[#allocation8 + $0x10] sm:$0xff] %v1136_v33 }
 0x139   :  { %1151 = dma.vmem_to_hbm [thread:$0]  %s1147_s2, 384, %s1149_s30, [#allocation4]  }
 0x13a   :  { %1265 = dma.done.wait [#allocation4], 384  }
 0x13b   :  { %1266 = vsyncadd [#allocation4], 4294966912 }
 0x13c   :  { %1156 = vsyncpa [#allocation3], 1 }
 0x13d   :  { %1157 = vsyncpa [#allocation6], 1 }
 0x13e   :  { %1158 = vsyncpa [#allocation4], 1 }

</bundles_post_ra>
